<compile_context>
chip_gen: v6e
topology: v6e:2x2x1
jax: 0.10.0
libtpu: 0.0.40
codegen_flags: <defaults>
</compile_context>

<pallas_src>
import jax
import jax.numpy as jnp
from jax.experimental import pallas as pl
from jax.experimental.pallas import tpu as pltpu


def _round_up(x, m):
    return ((x + m - 1) // m) * m


# ---------------------------------------------------------------------------
# Generation-aware VMEM budgets (128 MiB on v5e/v6e, 64 MiB on v7x)
# ---------------------------------------------------------------------------
_VMEM_CAPACITY = None


def _vmem_capacity_bytes():
    global _VMEM_CAPACITY
    if _VMEM_CAPACITY is None:
        cap = None
        try:
            cap = int(getattr(pltpu.get_tpu_info(), "vmem_capacity_bytes", 0)) or None
        except Exception:
            cap = None
        _VMEM_CAPACITY = cap if cap else 64 * 1024 * 1024   # conservative (v7x)
    return _VMEM_CAPACITY


def _pick_batch_tile(B, row_bytes, budget):
    """Largest batch tile whose double-buffered x block fits in `budget`."""
    cap = max(1, budget // (2 * row_bytes))
    if B <= cap:
        return B
    if cap >= 8:
        return (cap // 8) * 8     # keep the (TB, Cpad) output block sublane aligned
    return cap


def _pick_s_tile(S, D, itemsize, budget, tb):
    """Largest S tile that divides S, is a multiple of 8, and fits `budget`."""
    best = None
    for ts in range(8, S, 8):
        if S % ts == 0 and 2 * tb * ts * D * itemsize <= budget:
            best = ts
    return best


# ---------------------------------------------------------------------------
# Kernels
# ---------------------------------------------------------------------------
def _l2_normalize(p, enabled):
    if not enabled:
        return p
    # F.normalize: p / max(||p||, 1e-12) == p * rsqrt(max(||p||^2, 1e-24))
    sq = jnp.sum(p * p, axis=-1, keepdims=True)
    return p * jax.lax.rsqrt(jnp.maximum(sq, 1e-24))


def _make_flat_kernel(pool, normalize, inv_count=None):
    """1-D grid over batch. mean: x_ref is (TB, S, D); cls: x_ref is (TB, 1, D)."""

    def kernel(x_ref, w_ref, b_ref, o_ref):
        cls_tok = x_ref[:, 0, :].astype(jnp.float32)                  # (TB, D)
        if pool == "mean":
            # mean over patch tokens = (sum over ALL tokens - CLS) / (S - 1);
            # the cast to f32 is fused into the reduction (no f32 (TB,S,D) temp).
            sums = jnp.sum(x_ref[...], axis=1, dtype=jnp.float32)     # (TB, D)
            pooled = (sums - cls_tok) * inv_count
        else:  # "cls"
            pooled = cls_tok
        pooled = _l2_normalize(pooled, normalize)
        y = jnp.dot(pooled.astype(w_ref.dtype), w_ref[...],
                    preferred_element_type=jnp.float32)
        o_ref[...] = (y + b_ref[...]).astype(o_ref.dtype)

    return kernel


def _make_stiled_kernel(normalize, inv_count):
    """2-D grid (batch "parallel", S-tiles "arbitrary") with an f32 running-sum
    scratch accumulator; finalize (normalize + matmul + store) on the last tile."""

    def kernel(x_ref, w_ref, b_ref, o_ref, acc_ref):
        s = pl.program_id(1)
        blk_sum = jnp.sum(x_ref[...], axis=1, dtype=jnp.float32)      # (TB, D)

        @pl.when(s == 0)
        def _():
            # first S block contains the CLS token (token 0): exclude it.
            acc_ref[...] = blk_sum - x_ref[:, 0, :].astype(jnp.float32)

        @pl.when(s > 0)
        def _():
            acc_ref[...] += blk_sum

        @pl.when(s == pl.num_programs(1) - 1)
        def _():
            pooled = _l2_normalize(acc_ref[...] * inv_count, normalize)
            y = jnp.dot(pooled.astype(w_ref.dtype), w_ref[...],
                        preferred_element_type=jnp.float32)
            o_ref[...] = (y + b_ref[...]).astype(o_ref.dtype)

    return kernel


# ---------------------------------------------------------------------------
# Parameter prep (hoisted out of the per-call forward)
# ---------------------------------------------------------------------------
def prepare_linear_params(weight, bias, *, param_dtype=jnp.bfloat16):
    """weight: (num_classes, D), bias: (num_classes,) as in nn.Linear.
    Returns (w_t, b2d, num_classes):
      w_t: (D, Cpad) pre-transposed, zero-padded to a 128-multiple class dim,
           cast to `param_dtype` (bf16 default: 2-4x MXU throughput, half VMEM).
      b2d: (1, Cpad) f32 bias, added after the f32 MXU accumulate."""
    C, D = weight.shape
    Cpad = _round_up(C, 128)                       # lane-dense (527 -> 640)
    w_t = jnp.pad(weight.T.astype(param_dtype), ((0, 0), (0, Cpad - C)))
    b2d = jnp.pad(bias.astype(jnp.float32).reshape(1, C), ((0, 0), (0, Cpad - C)))
    return w_t, b2d, C


# ---------------------------------------------------------------------------
# Forward wrapper
# ---------------------------------------------------------------------------
_SINGLE_BUFFER_WEIGHTS = None     # does this jax build accept pl.Buffered(1)?


def _resident_spec(shape, single_buffer):
    index_map = lambda *_: (0,) * len(shape)       # constant -> DMA'd once
    if single_buffer:
        # resident operand: one buffer is enough, halves its VMEM footprint
        return pl.BlockSpec(shape, index_map, pipeline_mode=pl.Buffered(1))
    return pl.BlockSpec(shape, index_map)


def finetune_classifier_forward(x, w_t, b2d, num_classes, *, latent="mean",
                                normalize=True, batch_tile=None, s_tile=None,
                                out_dtype=None):
    """x: (B, S, D) encoder tokens (token 0 = CLS); w_t/b2d from prepare_linear_params.
    Returns (B, num_classes) logits.

    Caller contract: prefer handing x over in bf16 -- the mean path is pure HBM
    bandwidth bound on x (pooling still accumulates in f32 inside the kernel)."""
    global _SINGLE_BUFFER_WEIGHTS
    B, S, D = x.shape
    Cpad = w_t.shape[1]
    itemsize = x.dtype.itemsize

    cap = _vmem_capacity_bytes()
    x_budget = max(16 * 1024 * 1024, int(cap * 0.30))    # double-buffered x stream
    vmem_limit = max(32 * 1024 * 1024, int(cap * 0.75))  # headroom under physical VMEM

    if out_dtype is None:
        # cls path is store/latency bound: bf16 logits when the input is bf16.
        out_dtype = (jnp.bfloat16 if (latent == "cls" and x.dtype == jnp.bfloat16)
                     else jnp.float32)

    if latent == "cls":
        # DMA only token 0, straight from the 3-D input (no wrapper-side slice).
        row_bytes = D * itemsize
        TB = batch_tile if batch_tile is not None else _pick_batch_tile(B, row_bytes, x_budget)
        grid = (pl.cdiv(B, TB),)
        x_spec = pl.BlockSpec((TB, 1, D), lambda b: (b, 0, 0))
        kernel = _make_flat_kernel("cls", normalize)
        dims = ("parallel",)
        scratch = []
    else:
        if S < 2:
            raise ValueError("mean pooling needs at least one patch token (S >= 2)")
        inv_count = 1.0 / (S - 1)
        row_bytes = S * D * itemsize
        TB = batch_tile if batch_tile is not None else _pick_batch_tile(B, row_bytes, x_budget)
        TS = S
        if s_tile is not None:
            TS = int(s_tile)
        elif batch_tile is None and TB < min(8, B):
            # v7x fallback: S*D too large for an 8-row batch tile -> tile S instead.
            cand = _pick_s_tile(S, D, itemsize, x_budget, tb=min(8, B))
            if cand is not None:
                TB, TS = min(8, B), cand
        if TS != S:
            if S % TS != 0 or TS % 8 != 0:
                raise ValueError("s_tile must divide S and be a multiple of 8")
            grid = (pl.cdiv(B, TB), S // TS)
            x_spec = pl.BlockSpec((TB, TS, D), lambda b, s: (b, s, 0))
            kernel = _make_stiled_kernel(normalize, inv_count)
            dims = ("parallel", "arbitrary")
            scratch = [pltpu.VMEM((TB, D), jnp.float32)]
        else:
            grid = (pl.cdiv(B, TB),)
            x_spec = pl.BlockSpec((TB, S, D), lambda b: (b, 0, 0))
            kernel = _make_flat_kernel("mean", normalize, inv_count)
            dims = ("parallel",)
            scratch = []

    out_spec = pl.BlockSpec((TB, Cpad), lambda b, *_: (b, 0))

    def run(single_buffer):
        return pl.pallas_call(
            kernel,
            out_shape=jax.ShapeDtypeStruct((B, Cpad), out_dtype),
            grid=grid,
            in_specs=[x_spec,
                      _resident_spec((D, Cpad), single_buffer),   # weight: resident
                      _resident_spec((1, Cpad), single_buffer)],  # bias:   resident
            out_specs=out_spec,
            scratch_shapes=scratch,
            compiler_params=pltpu.CompilerParams(
                dimension_semantics=dims,           # megacore split on batch axis
                vmem_limit_bytes=vmem_limit,
            ),
        )(x, w_t, b2d)

    if _SINGLE_BUFFER_WEIGHTS is None:
        try:
            out = jax.block_until_ready(run(True))
            _SINGLE_BUFFER_WEIGHTS = True
        except Exception:
            _SINGLE_BUFFER_WEIGHTS = False
            out = run(False)
    else:
        out = run(_SINGLE_BUFFER_WEIGHTS)

    return out[:, :num_classes]                     # drop padded classes


# ---------------------------------------------------------------------------
# Pure-JAX reference (mirrors the PyTorch forward)
# ---------------------------------------------------------------------------
def _reference(x, weight, bias, *, latent="mean", normalize=True):
    if latent == "cls":
        p = x[:, 0]
    else:
        p = jnp.mean(x[:, 1:], axis=1)
    if normalize:
        n = jnp.sqrt(jnp.sum(p * p, axis=-1, keepdims=True))
        p = p / jnp.maximum(n, 1e-12)
    return p @ weight.T + bias


if __name__ == "__main__":
    # batch=2, tokens = 1 (cls) + 8 patches = 9, hidden dim = 32, classes = 527.
    B, S, D, C = 2, 9, 32, 527
    key = jax.random.PRNGKey(0)
    kx, kw = jax.random.split(key)

    x = jax.random.normal(kx, (B, S, D), dtype=jnp.float32)
    weight = 0.01 * jax.random.normal(kw, (C, D), dtype=jnp.float32)   # std=0.01 init
    bias = jnp.zeros((C,), dtype=jnp.float32)

    # --- f32 params: tight numerical check of the kernel math --------------
    w32, b32, nc = prepare_linear_params(weight, bias, param_dtype=jnp.float32)

    out = jax.block_until_ready(
        finetune_classifier_forward(x, w32, b32, nc, latent="mean", normalize=True))
    ref = _reference(x, weight, bias, latent="mean", normalize=True)
    assert out.shape == (B, C)
    assert jnp.allclose(out, ref, atol=1e-5, rtol=1e-5), "mean path mismatch"

    out_cls = jax.block_until_ready(
        finetune_classifier_forward(x, w32, b32, nc, latent="cls", normalize=True))
    ref_cls = _reference(x, weight, bias, latent="cls", normalize=True)
    assert jnp.allclose(out_cls, ref_cls, atol=1e-5, rtol=1e-5), "cls path mismatch"

    # --- production contract: bf16 tokens + bf16 weights --------------------
    wbf, bbf, _ = prepare_linear_params(weight, bias)                   # bf16 weight
    B2, S2 = 16, 16
    x2 = jax.random.normal(jax.random.PRNGKey(1), (B2, S2, D),
                           dtype=jnp.float32).astype(jnp.bfloat16)
    ref2 = _reference(x2.astype(jnp.float32), weight, bias, latent="mean")

    # tiled batch grid (pipelined DMA across batch tiles)
    out2 = jax.block_until_ready(
        finetune_classifier_forward(x2, wbf, bbf, nc, latent="mean", batch_tile=8))
    assert jnp.allclose(out2, ref2, atol=2e-2, rtol=2e-2), "bf16 tiled mean mismatch"

    # forced S-tiled accumulator path (v7x fallback for large S*D)
    out3 = jax.block_until_ready(
        finetune_classifier_forward(x2, wbf, bbf, nc, latent="mean",
                                    batch_tile=8, s_tile=8))
    assert jnp.allclose(out3, ref2, atol=2e-2, rtol=2e-2), "S-tiled mean mismatch"

    # cls path with bf16 logits (only token 0 is DMA'd)
    out4 = jax.block_until_ready(
        finetune_classifier_forward(x2, wbf, bbf, nc, latent="cls"))
    ref4 = _reference(x2.astype(jnp.float32), weight, bias, latent="cls")
    assert out4.dtype == jnp.bfloat16
    assert jnp.allclose(out4.astype(jnp.float32), ref4, atol=3e-2, rtol=3e-2), \
        "bf16 cls path mismatch"

    print("KERNEL_OK")
</pallas_src>

<mosaic_0001>
module attributes {stable_mosaic.version = 11 : i64} {
  func.func @kernel(%arg0: i32, %arg1: memref<2x9x32xf32, #tpu.memory_space<vmem>>, %arg2: memref<32x640xf32, #tpu.memory_space<vmem>>, %arg3: memref<1x640xf32, #tpu.memory_space<vmem>>, %arg4: memref<2x640xf32, #tpu.memory_space<vmem>>) attributes {dimension_semantics = [#tpu.dimension_semantics<parallel>], iteration_bounds = array<i64: 1>, scalar_prefetch = 0 : i64, scratch_operands = 0 : i64, tpu.core_type = #tpu.core_type<tc>, window_params = [{transform_indices = @transform_0, window_bounds = array<i64: 2, 9, 32>}, {pipeline_mode = #tpu.pipeline_mode<synchronous>, transform_indices = @transform_1, window_bounds = array<i64: 32, 640>}, {pipeline_mode = #tpu.pipeline_mode<synchronous>, transform_indices = @transform_2, window_bounds = array<i64: 1, 640>}, {transform_indices = @transform_3, window_bounds = array<i64: 2, 640>}]} {
    %c0 = arith.constant 0 : index
    %c0_0 = arith.constant 0 : index
    %c0_1 = arith.constant 0 : index
    %0 = vector.load %arg1[%c0, %c0_0, %c0_1] : memref<2x9x32xf32, #tpu.memory_space<vmem>>, vector<2x1x32xf32>
    %1 = vector.shape_cast %0 : vector<2x1x32xf32> to vector<2x32xf32>
    %c0_2 = arith.constant 0 : index
    %c0_3 = arith.constant 0 : index
    %c0_4 = arith.constant 0 : index
    %2 = vector.load %arg1[%c0_2, %c0_3, %c0_4] : memref<2x9x32xf32, #tpu.memory_space<vmem>>, vector<2x9x32xf32>
    %cst = arith.constant dense<0.000000e+00> : vector<2x32xf32>
    %3 = vector.multi_reduction <add>, %2, %cst [1] : vector<2x9x32xf32> to vector<2x32xf32>
    %4 = arith.subf %3, %1 : vector<2x32xf32>
    %cst_5 = arith.constant 1.250000e-01 : f32
    %5 = vector.broadcast %cst_5 : f32 to vector<2x32xf32>
    %6 = arith.mulf %4, %5 : vector<2x32xf32>
    %7 = arith.mulf %6, %6 : vector<2x32xf32>
    %cst_6 = arith.constant dense<0.000000e+00> : vector<2xf32>
    %8 = vector.multi_reduction <add>, %7, %cst_6 [1] : vector<2x32xf32> to vector<2xf32>
    %9 = vector.shape_cast %8 : vector<2xf32> to vector<2x1xf32>
    %cst_7 = arith.constant 1.000000e-24 : f32
    %10 = vector.broadcast %cst_7 : f32 to vector<2x1xf32>
    %11 = arith.maximumf %9, %10 : vector<2x1xf32>
    %12 = math.rsqrt %11 : vector<2x1xf32>
    %13 = vector.broadcast %12 : vector<2x1xf32> to vector<2x32xf32>
    %14 = arith.mulf %6, %13 : vector<2x32xf32>
    %c0_8 = arith.constant 0 : index
    %c0_9 = arith.constant 0 : index
    %15 = vector.load %arg2[%c0_8, %c0_9] : memref<32x640xf32, #tpu.memory_space<vmem>>, vector<32x640xf32>
    %cst_10 = arith.constant dense<0.000000e+00> : vector<2x640xf32>
    %16 = tpu.matmul %14, %15, %cst_10 {dimension_numbers = #tpu.dot_dimension_numbers<[1], [0], [0], [1], [0, 0, 1, 1], [], []>} : vector<2x32xf32>, vector<32x640xf32>, vector<2x640xf32> -> vector<2x640xf32>
    %c0_11 = arith.constant 0 : index
    %c0_12 = arith.constant 0 : index
    %17 = vector.load %arg3[%c0_11, %c0_12] : memref<1x640xf32, #tpu.memory_space<vmem>>, vector<1x640xf32>
    %18 = vector.broadcast %17 : vector<1x640xf32> to vector<2x640xf32>
    %19 = arith.addf %16, %18 : vector<2x640xf32>
    %c0_13 = arith.constant 0 : index
    %c0_14 = arith.constant 0 : index
    %20 = vector.load %arg4[%c0_13, %c0_14] : memref<2x640xf32, #tpu.memory_space<vmem>>, vector<2x640xf32>
    tpu.vector_store %arg4[%c0_13, %c0_14], %19 {strides = array<i32>} : memref<2x640xf32, #tpu.memory_space<vmem>>, vector<2x640xf32>,
    return
  }
  func.func @transform_0(%arg0: i32) -> (i32, i32, i32) {
    %c0_i32 = arith.constant 0 : i32
    %c0_i32_0 = arith.constant 0 : i32
    %c0_i32_1 = arith.constant 0 : i32
    return %arg0, %c0_i32, %c0_i32_0 : i32, i32, i32
  }
  func.func @transform_1(%arg0: i32) -> (i32, i32) {
    %c0_i32 = arith.constant 0 : i32
    %c0_i32_0 = arith.constant 0 : i32
    %c0_i32_1 = arith.constant 0 : i32
    return %c0_i32, %c0_i32_0 : i32, i32
  }
  func.func @transform_2(%arg0: i32) -> (i32, i32) {
    %c0_i32 = arith.constant 0 : i32
    %c0_i32_0 = arith.constant 0 : i32
    %c0_i32_1 = arith.constant 0 : i32
    return %c0_i32, %c0_i32_0 : i32, i32
  }
  func.func @transform_3(%arg0: i32) -> (i32, i32) {
    %c0_i32 = arith.constant 0 : i32
    %c0_i32_0 = arith.constant 0 : i32
    return %arg0, %c0_i32 : i32, i32
  }
}

module attributes {stable_mosaic.version = 11 : i64} {
  func.func @kernel(%arg0: i32, %arg1: memref<2x9x32xf32, #tpu.memory_space<vmem>>, %arg2: memref<32x640xf32, #tpu.memory_space<vmem>>, %arg3: memref<1x640xf32, #tpu.memory_space<vmem>>, %arg4: memref<2x640xf32, #tpu.memory_space<vmem>>) attributes {dimension_semantics = [#tpu.dimension_semantics<parallel>], iteration_bounds = array<i64: 1>, scalar_prefetch = 0 : i64, scratch_operands = 0 : i64, tpu.core_type = #tpu.core_type<tc>, window_params = [{transform_indices = @transform_0, window_bounds = array<i64: 2, 9, 32>}, {pipeline_mode = #tpu.pipeline_mode<synchronous>, transform_indices = @transform_1, window_bounds = array<i64: 32, 640>}, {pipeline_mode = #tpu.pipeline_mode<synchronous>, transform_indices = @transform_2, window_bounds = array<i64: 1, 640>}, {transform_indices = @transform_3, window_bounds = array<i64: 2, 640>}]} {
    %c0 = arith.constant 0 : index
    %c0_0 = arith.constant 0 : index
    %c0_1 = arith.constant 0 : index
    %0 = vector.load %arg1[%c0, %c0_0, %c0_1] : memref<2x9x32xf32, #tpu.memory_space<vmem>>, vector<2x1x32xf32>
    %1 = vector.shape_cast %0 : vector<2x1x32xf32> to vector<2x32xf32>
    %c0_2 = arith.constant 0 : index
    %c0_3 = arith.constant 0 : index
    %c0_4 = arith.constant 0 : index
    %2 = vector.load %arg1[%c0_2, %c0_3, %c0_4] : memref<2x9x32xf32, #tpu.memory_space<vmem>>, vector<2x9x32xf32>
    %cst = arith.constant dense<0.000000e+00> : vector<2x32xf32>
    %3 = vector.multi_reduction <add>, %2, %cst [1] : vector<2x9x32xf32> to vector<2x32xf32>
    %4 = arith.subf %3, %1 : vector<2x32xf32>
    %cst_5 = arith.constant 1.250000e-01 : f32
    %5 = vector.broadcast %cst_5 : f32 to vector<2x32xf32>
    %6 = arith.mulf %4, %5 : vector<2x32xf32>
    %7 = arith.mulf %6, %6 : vector<2x32xf32>
    %cst_6 = arith.constant dense<0.000000e+00> : vector<2xf32>
    %8 = vector.multi_reduction <add>, %7, %cst_6 [1] : vector<2x32xf32> to vector<2xf32>
    %9 = vector.shape_cast %8 : vector<2xf32> to vector<2x1xf32>
    %cst_7 = arith.constant 1.000000e-24 : f32
    %10 = vector.broadcast %cst_7 : f32 to vector<2x1xf32>
    %11 = arith.maximumf %9, %10 : vector<2x1xf32>
    %12 = math.rsqrt %11 : vector<2x1xf32>
    %13 = vector.broadcast %12 : vector<2x1xf32> to vector<2x32xf32>
    %14 = arith.mulf %6, %13 : vector<2x32xf32>
    %c0_8 = arith.constant 0 : index
    %c0_9 = arith.constant 0 : index
    %15 = vector.load %arg2[%c0_8, %c0_9] : memref<32x640xf32, #tpu.memory_space<vmem>>, vector<32x640xf32>
    %cst_10 = arith.constant dense<0.000000e+00> : vector<2x640xf32>
    %16 = tpu.matmul %14, %15, %cst_10 {dimension_numbers = #tpu.dot_dimension_numbers<[1], [0], [0], [1], [0, 0, 1, 1], [], []>} : vector<2x32xf32>, vector<32x640xf32>, vector<2x640xf32> -> vector<2x640xf32>
    %c0_11 = arith.constant 0 : index
    %c0_12 = arith.constant 0 : index
    %17 = vector.load %arg3[%c0_11, %c0_12] : memref<1x640xf32, #tpu.memory_space<vmem>>, vector<1x640xf32>
    %18 = vector.broadcast %17 : vector<1x640xf32> to vector<2x640xf32>
    %19 = arith.addf %16, %18 : vector<2x640xf32>
    %c0_13 = arith.constant 0 : index
    %c0_14 = arith.constant 0 : index
    %20 = vector.load %arg4[%c0_13, %c0_14] : memref<2x640xf32, #tpu.memory_space<vmem>>, vector<2x640xf32>
    tpu.vector_store %arg4[%c0_13, %c0_14], %19 {strides = array<i32>} : memref<2x640xf32, #tpu.memory_space<vmem>>, vector<2x640xf32>,
    return
  }
  func.func @transform_0(%arg0: i32) -> (i32, i32, i32) {
    %c0_i32 = arith.constant 0 : i32
    %c0_i32_0 = arith.constant 0 : i32
    %c0_i32_1 = arith.constant 0 : i32
    return %arg0, %c0_i32, %c0_i32_0 : i32, i32, i32
  }
  func.func @transform_1(%arg0: i32) -> (i32, i32) {
    %c0_i32 = arith.constant 0 : i32
    %c0_i32_0 = arith.constant 0 : i32
    %c0_i32_1 = arith.constant 0 : i32
    return %c0_i32, %c0_i32_0 : i32, i32
  }
  func.func @transform_2(%arg0: i32) -> (i32, i32) {
    %c0_i32 = arith.constant 0 : i32
    %c0_i32_0 = arith.constant 0 : i32
    %c0_i32_1 = arith.constant 0 : i32
    return %c0_i32, %c0_i32_0 : i32, i32
  }
  func.func @transform_3(%arg0: i32) -> (i32, i32) {
    %c0_i32 = arith.constant 0 : i32
    %c0_i32_0 = arith.constant 0 : i32
    return %arg0, %c0_i32 : i32, i32
  }
}

</mosaic_0001>

<bundles_post_ra>
// kernel: tpu_custom_call.1
= control target key start
LH: loop header
LB: loop body
LE: loop exit
PB: predicated region body
PF: predicated region fallthrough
CT: control target
= control target key end

     0   :  { %8 = vsyncpa [#allocation3], 0  ;;  %s526_s0 = inlined_call_operand.vmem [shape: f32[2,9,32], index: 0, kind: input, shape index: {}]   ;;  %s527_s1 = inlined_call_operand.hbm [shape: f32[32,640], index: 1, kind: input, shape index: {}]   ;;  %s528_s2 = inlined_call_operand.vmem [shape: f32[1,640], index: 2, kind: input, shape index: {}]   ;;  %s529_s3 = inlined_call_operand.hbm [shape: f32[2,640], index: 3, kind: output, shape index: {}]  }
   0x1   :  { %9 = vsyncpa [#allocation4], 0  ;;  %s465_s12 = smov [#allocation2]  }
   0x2   :  { %s17_s13 = sshll.u32 %s465_s12, 4  ;;  %s18_s13 = int_to_ptr.vmem [resolvable:$true] %s17_s13 }
   0x3   :  { %s429_s14 = scalar_lea.vmem %s18_s13, 2560  ;;  %p434_p1 = scmp.lt.s32.totalorder %s18_s13, %s18_s13 }
   0x4   :  { %p430_p0 = scmp.ne.s32.totalorder %s18_s13, %s429_s14  ;;  %p435_p2 = scmp.lt.s32.totalorder %s429_s14, %s429_s14 }
   0x6   :  { %p436_p3 = por %p435_p2, %p434_p1 }
   0x8   :  { %p437_p4 = pnand %p436_p3, %p430_p0 }
   0xa   :  { %440 = shalt.err (!%p437_p4)
}
   0xb   :  { %s466_s15 = smov 640   ;;  %s467_s16 = smov 40  }
   0xc   :  { %23 = dma.hbm_to_vmem [thread:$0]  %s527_s1, 2560, %s18_s13, [#allocation3], %s466_s15, %s466_s15, %s467_s16  }
   0xd   :  { %461 = dma.done.wait [#allocation3], 2560  }
   0xe   :  { %462 = vsyncadd [#allocation3], 4294964736  ;;  %vm35_vm0 = vcmask 261120   ;;  %vm37_vm1 = vcmask 253952   ;;  %v31_v0 = vld [vmem:[%s526_s0] sm:$0xff]  ;;  %v33_v2 = vld [vmem:[%s526_s0 + $0x10] sm:$0xff]  ;;  %v101_v62 = vlaneseq }
   0xf   :  { %v32_v1 = vld [vmem:[%s526_s0 + $0x8] sm:$0x1]  ;;  %v34_v3 = vld [vmem:[%s526_s0 + $0x18] sm:$0x1]  ;;  %v36_v4 = vsel %vm35_vm0, %v31_v0, 0.0  ;;  %v46_v6 = vsel %vm35_vm0, %v33_v2, 0.0 }
  0x10   :  { %v38_v5 = vsel %vm37_vm1, %v32_v1, 0.0  ;;  %v47_v7 = vsel %vm37_vm1, %v34_v3, 0.0  ;;  %v29_v20 = vld [vmem:[%s526_s0] sm:$0x1]  ;;  %v30_v21 = vld [vmem:[%s526_s0 + $0x10] sm:$0x1] }
  0x11   :  { %v39_v8 = vadd.f32 %v38_v5, %v36_v4  ;;  %v48_v9 = vadd.f32 %v47_v7, %v46_v6  ;;  %vm64_vm2 = vcmask 1041409   ;;  %vm67_vm3 = vcmask 254976   ;;  %v95_v33 = vld [vmem:[#allocation2 + $0x80] sm:$0xff]  ;;  %v94_v34 = vld [vmem:[#allocation2 + $0x78] sm:$0xff]  ;;  %v97_v35 = vld [vmem:[#allocation2 + $0x90] sm:$0xff]  ;;  %s471_s4 = smov [#allocation5]  }
  0x12   :  { %156 = vmatprep.subr.mxu0 %v95_v33  ;;  %227 = vmatprep.subr.mxu1 %v97_v35  ;;  %v90_v36 = vld [vmem:[#allocation2 + $0x58] sm:$0xff]  ;;  %v96_v37 = vld [vmem:[#allocation2 + $0x88] sm:$0xff]  ;;  %v89_v38 = vld [vmem:[#allocation2 + $0x50] sm:$0xff]  ;;  %v468_v49 = vmov 0.0   ;;  %vm469_vm4 = vmmov 0   ;;  %v102_v63 = vshrl.u32 %v101_v62, 7 }
  0x13   :  { %v40_v10 = vrot.slane %v39_v8, 4  ;;  %v49_v11 = vrot.slane %v48_v9, 4  ;;  %157 = vmatpush1.msra.mxu0 %v94_v34  ;;  %228 = vmatpush1.msra.mxu1 %v96_v37  ;;  %v92_v39 = vld [vmem:[#allocation2 + $0x68] sm:$0xff]  ;;  %v85_v40 = vld [vmem:[#allocation2 + $0x30] sm:$0xff]  ;;  %v91_v41 = vld [vmem:[#allocation2 + $0x60] sm:$0xff] }
  0x14   :  { %158 = vmatprep.subr.mxu0 %v90_v36  ;;  %229 = vmatprep.subr.mxu1 %v92_v39  ;;  %v84_v42 = vld [vmem:[#allocation2 + $0x28] sm:$0xff]  ;;  %v87_v43 = vld [vmem:[#allocation2 + $0x40] sm:$0xff]  ;;  %v86_v45 = vld [vmem:[#allocation2 + $0x38] sm:$0xff]  ;;  %v470_v0 = vmov 1983009808   ;;  %v103_v2 = vsub.s32 0, %v102_v63 }
  0x15   :  { %v41_v12 = vadd.f32 %v40_v10, %v39_v8  ;;  %v50_v13 = vadd.f32 %v49_v11, %v48_v9  ;;  %159 = vmatpush1.msra.mxu0 %v89_v38  ;;  %230 = vmatpush1.msra.mxu1 %v91_v41  ;;  %v80_v44 = vld [vmem:[#allocation2 + $0x8] sm:$0xff]  ;;  %v82_v46 = vld [vmem:[#allocation2 + $0x18] sm:$0xff]  ;;  %v79_v47 = vld [vmem:[#allocation2] sm:$0xff]  ;;  %v352_v1 = vunpack.c.l.s4 %v470_v0  ;;  %v111_v3 = vsub.s32 2, %v102_v63 }
  0x16   :  { %160 = vmatprep.subr.mxu0 %v85_v40  ;;  %231 = vmatprep.subr.mxu1 %v87_v43  ;;  %v81_v48 = vld [vmem:[#allocation2 + $0x10] sm:$0xff]  ;;  %v98_v57 = vld [vmem:[#allocation2 + $0x98] sm:$0xff]  ;;  %v88_v60 = vld [vmem:[#allocation2 + $0x48] sm:$0xff]  ;;  %v107_v4 = vsub.s32 1, %v102_v63  ;;  %v115_v5 = vsub.s32 3, %v102_v63 }
  0x17   :  { %v42_v14 = vrot.slane %v41_v12, 2  ;;  %v51_v15 = vrot.slane %v50_v13, 2  ;;  %161 = vmatpush1.msra.mxu0 %v84_v42  ;;  %232 = vmatpush1.msra.mxu1 %v86_v45  ;;  %v93_v59 = vld [vmem:[#allocation2 + $0x70] sm:$0xff]  ;;  %v83_v61 = vld [vmem:[#allocation2 + $0x20] sm:$0xff]  ;;  %v353_v7 = vunpack.c.0.s8 %v352_v1 }
  0x18   :  { %162 = vmatprep.subr.mxu0 %v80_v44  ;;  %233 = vmatprep.subr.mxu1 %v82_v46  ;;  %v99_v6 = vld [vmem:[%s528_s2] sm:$0x1f]  ;;  %s383_s2 = sshll.u32 %s471_s4, 4  ;;  %s384_s2 = int_to_ptr.vmem [resolvable:$true] %s383_s2 }
  0x19   :  { %v43_v16 = vadd.f32 %v42_v14, %v41_v12  ;;  %v52_v17 = vadd.f32 %v51_v15, %v50_v13  ;;  %163 = vmatpush1.msra.mxu0 %v79_v47  ;;  %196 = vmatprep.mubr.f32.mxu0 %v468_v49  ;;  %v104_v8 = vrot.slane %v99_v6, %v103_v2  ;;  %v119_v14 = vsub.s32 4, %v102_v63  ;;  %s441_s5 = scalar_lea.vmem %s384_s2, 160  ;;  %p446_p6 = scmp.lt.s32.totalorder %s384_s2, %s384_s2 }
  0x1a   :  { %234 = vmatpush1.msra.mxu1 %v81_v48  ;;  %267 = vmatprep.mubr.f32.mxu1 %v468_v49  ;;  %v112_v9 = vrot.slane %v99_v6, %v111_v3  ;;  %v108_v10 = vrot.slane %v99_v6, %v107_v4  ;;  %v116_v11 = vrot.slane %v99_v6, %v115_v5  ;;  %p442_p5 = scmp.ne.s32.totalorder %s384_s2, %s441_s5  ;;  %p447_p7 = scmp.lt.s32.totalorder %s441_s5, %s441_s5 }
  0x1b   :  { %v44_v18 = vrot.slane %v43_v16, 1  ;;  %v53_v19 = vrot.slane %v52_v17, 1  ;;  %401 = vmatprep.subr.mxu0 %v468_v49 }
  0x1c   :  { %p448_p8 = por %p447_p7, %p446_p6 }
  0x1d   :  { %v45_v22 = vadd.f32 %v44_v18, %v43_v16  ;;  %v54_v23 = vadd.f32 %v53_v19, %v52_v17  ;;  %v356_v16 = vsub.s32 %v353_v7, %v102_v63 }
  0x1e   :  { %p449_p9 = pnand %p448_p8, %p442_p5 }
  0x1f   :  { %v55_v24 = vsub.f32 %v45_v22, %v29_v20  ;;  %v56_v25 = vsub.f32 %v54_v23, %v30_v21 }
  0x21   :  { %v57_v26 = vmul.f32 0.125, %v55_v24  ;;  %v58_v27 = vmul.f32 0.125, %v56_v25  ;;  %v120_v24 = vrot.slane %v99_v6, %v119_v14 }
  0x23   :  { %v59_v28 = vmul.f32 %v57_v26, %v57_v26  ;;  %v60_v29 = vmul.f32 %v58_v27, %v58_v27 }
  0x25   :  { %v63_v30 = vrot.slane %v60_v29, 7 }
  0x27   :  { %v65_v31 = vsel %vm64_vm2, %v63_v30, %v59_v28 }
  0x28   :  { %v68_v32 = vsel %vm67_vm3, %v65_v31, 0.0 }
  0x29   :  { %69 = vadd.xlane.f32.xlu0 %v68_v32 }
  0xb2   :  { %v70_v50 = vpop.xlane.xlu0 %69 }
  0xb3   :  { %v71_v51 = vmax.f32 %v70_v50, 1e-24 }
  0xb5   :  { %419 = vrsqrt.f32 %v71_v51 }
  0xc2   :  { %v420_v52 = vpop.eup %419 }
  0xc3   :  { %v74_v53 = vrot.slane %v420_v52, 1  ;;  %v77_v55 = vmul.f32 %v420_v52, %v57_v26 }
  0xc5   :  { %v78_v54 = vmul.f32 %v74_v53, %v58_v27 }
  0xc7   :  { %v128_v56 = vrot.slane %v78_v54, 7 }
  0xc9   :  { %v129_v58 = vsel %vm64_vm2, %v128_v56, %v77_v55 }
  0xca   :  { %392 = vmatmul.mubr.msk.f32.vlgmr.msra.gmra.mxu0 %vm35_vm0, %v129_v58  ;;  %393 = vmatmul.mubr.msk.f32.vlgmr.msra.gmra.mxu1 %vm35_vm0, %v129_v58 }
  0xcb   :  { %402 = vmatpush3.msra.mxu0 %v98_v57  ;;  %409 = vmatprep.mubr.msk.f32.mxu0 %vm469_vm4, %v468_v49 }
  0xcc   :  { %403 = vmatprep.subr.mxu0 %v468_v49 }
  0xcd   :  { %404 = vmatpush3.msra.mxu0 %v93_v59 }
  0xce   :  { %405 = vmatprep.subr.mxu0 %v468_v49 }
  0xcf   :  { %406 = vmatpush3.msra.mxu0 %v88_v60 }
  0xd0   :  { %407 = vmatprep.subr.mxu0 %v468_v49 }
  0xd1   :  { %408 = vmatpush3.msra.mxu0 %v83_v61 }
  0xd2   :  { %410 = vmatmul.mubr.msk.f32.vlgmr.msra.gmra.mxu0 %vm35_vm0, %v129_v58 }
 0x18a   :  { %v198_v12 = vpop.f32.mrf.mxu0  ;;  %v269_v13 = vpop.f32.mrf.mxu1 }
 0x18b   :  { %v199_v18 = vadd.f32 %v198_v12, %v104_v8  ;;  %v270_v19 = vadd.f32 %v269_v13, %v112_v9 }
 0x18c   :  { %v200_v15 = vpop.f32.mrf.mxu0  ;;  %v271_v17 = vpop.f32.mrf.mxu1 }
 0x18d   :  { %v201_v20 = vadd.f32 %v200_v15, %v108_v10  ;;  %v272_v21 = vadd.f32 %v271_v17, %v116_v11 }
 0x18f   :  { %v349_v22 = vcombine.low %v199_v18, %v201_v20  ;;  %v350_v23 = vcombine.low %v270_v19, %v272_v21 }
 0x191   :  { %v357_v25 = vrot.slane %v349_v22, %v356_v16  ;;  %v364_v26 = vrot.slane %v350_v23, %v356_v16 }
 0x192   :  { %v340_v27 = vpop.f32.mrf.mxu0 }
 0x193   :  { %v341_v28 = vadd.f32 %v340_v27, %v120_v24  ;;  %v365_v29 = vcombine.low %v357_v25, %v364_v26 }
 0x194   :  { %v411_v30 = vpop.f32.mrf.mxu0 }
 0x195   :  { %395 = vst.sshfl [vmem:[#allocation5 + $0x8] sm:$0x3 pattern:$0x76325410] %v341_v28  ;;  %375 = vst [vmem:[#allocation5] sm:$0xff] %v365_v29 }
 0x196   :  { %452 = shalt.err (!%p449_p9)
}
 0x197   :  { %386 = dma.vmem_to_hbm [thread:$0]  %s384_s2, 160, %s529_s3, [#allocation4]  }
 0x198   :  { %463 = dma.done.wait [#allocation4], 160  }
 0x199   :  { %464 = vsyncadd [#allocation4], 4294967136 }
 0x19a   :  { %390 = vsyncpa [#allocation3], 1 }
 0x19b   :  { %391 = vsyncpa [#allocation4], 1 }

// kernel: tpu_custom_call.1
= control target key start
LH: loop header
LB: loop body
LE: loop exit
PB: predicated region body
PF: predicated region fallthrough
CT: control target
= control target key end

     0   :  { %8 = vsyncpa [#allocation3], 0  ;;  %s526_s0 = inlined_call_operand.vmem [shape: f32[2,9,32], index: 0, kind: input, shape index: {}]   ;;  %s527_s1 = inlined_call_operand.hbm [shape: f32[32,640], index: 1, kind: input, shape index: {}]   ;;  %s528_s2 = inlined_call_operand.vmem [shape: f32[1,640], index: 2, kind: input, shape index: {}]   ;;  %s529_s3 = inlined_call_operand.hbm [shape: f32[2,640], index: 3, kind: output, shape index: {}]  }
   0x1   :  { %9 = vsyncpa [#allocation4], 0  ;;  %s465_s12 = smov [#allocation2]  }
   0x2   :  { %s17_s13 = sshll.u32 %s465_s12, 4  ;;  %s18_s13 = int_to_ptr.vmem [resolvable:$true] %s17_s13 }
   0x3   :  { %s429_s14 = scalar_lea.vmem %s18_s13, 2560  ;;  %p434_p1 = scmp.lt.s32.totalorder %s18_s13, %s18_s13 }
   0x4   :  { %p430_p0 = scmp.ne.s32.totalorder %s18_s13, %s429_s14  ;;  %p435_p2 = scmp.lt.s32.totalorder %s429_s14, %s429_s14 }
   0x6   :  { %p436_p3 = por %p435_p2, %p434_p1 }
   0x8   :  { %p437_p4 = pnand %p436_p3, %p430_p0 }
   0xa   :  { %440 = shalt.err (!%p437_p4)
}
   0xb   :  { %s466_s15 = smov 640   ;;  %s467_s16 = smov 40  }
   0xc   :  { %23 = dma.hbm_to_vmem [thread:$0]  %s527_s1, 2560, %s18_s13, [#allocation3], %s466_s15, %s466_s15, %s467_s16  }
   0xd   :  { %461 = dma.done.wait [#allocation3], 2560  }
   0xe   :  { %462 = vsyncadd [#allocation3], 4294964736  ;;  %vm35_vm0 = vcmask 261120   ;;  %vm37_vm1 = vcmask 253952   ;;  %v31_v0 = vld [vmem:[%s526_s0] sm:$0xff]  ;;  %v33_v2 = vld [vmem:[%s526_s0 + $0x10] sm:$0xff]  ;;  %v101_v62 = vlaneseq }
   0xf   :  { %v32_v1 = vld [vmem:[%s526_s0 + $0x8] sm:$0x1]  ;;  %v34_v3 = vld [vmem:[%s526_s0 + $0x18] sm:$0x1]  ;;  %v36_v4 = vsel %vm35_vm0, %v31_v0, 0.0  ;;  %v46_v6 = vsel %vm35_vm0, %v33_v2, 0.0 }
  0x10   :  { %v38_v5 = vsel %vm37_vm1, %v32_v1, 0.0  ;;  %v47_v7 = vsel %vm37_vm1, %v34_v3, 0.0  ;;  %v29_v20 = vld [vmem:[%s526_s0] sm:$0x1]  ;;  %v30_v21 = vld [vmem:[%s526_s0 + $0x10] sm:$0x1] }
  0x11   :  { %v39_v8 = vadd.f32 %v38_v5, %v36_v4  ;;  %v48_v9 = vadd.f32 %v47_v7, %v46_v6  ;;  %vm64_vm2 = vcmask 1041409   ;;  %vm67_vm3 = vcmask 254976   ;;  %v95_v33 = vld [vmem:[#allocation2 + $0x80] sm:$0xff]  ;;  %v94_v34 = vld [vmem:[#allocation2 + $0x78] sm:$0xff]  ;;  %v97_v35 = vld [vmem:[#allocation2 + $0x90] sm:$0xff]  ;;  %s471_s4 = smov [#allocation5]  }
  0x12   :  { %156 = vmatprep.subr.mxu0 %v95_v33  ;;  %227 = vmatprep.subr.mxu1 %v97_v35  ;;  %v90_v36 = vld [vmem:[#allocation2 + $0x58] sm:$0xff]  ;;  %v96_v37 = vld [vmem:[#allocation2 + $0x88] sm:$0xff]  ;;  %v89_v38 = vld [vmem:[#allocation2 + $0x50] sm:$0xff]  ;;  %v468_v49 = vmov 0.0   ;;  %vm469_vm4 = vmmov 0   ;;  %v102_v63 = vshrl.u32 %v101_v62, 7 }
  0x13   :  { %v40_v10 = vrot.slane %v39_v8, 4  ;;  %v49_v11 = vrot.slane %v48_v9, 4  ;;  %157 = vmatpush1.msra.mxu0 %v94_v34  ;;  %228 = vmatpush1.msra.mxu1 %v96_v37  ;;  %v92_v39 = vld [vmem:[#allocation2 + $0x68] sm:$0xff]  ;;  %v85_v40 = vld [vmem:[#allocation2 + $0x30] sm:$0xff]  ;;  %v91_v41 = vld [vmem:[#allocation2 + $0x60] sm:$0xff] }
  0x14   :  { %158 = vmatprep.subr.mxu0 %v90_v36  ;;  %229 = vmatprep.subr.mxu1 %v92_v39  ;;  %v84_v42 = vld [vmem:[#allocation2 + $0x28] sm:$0xff]  ;;  %v87_v43 = vld [vmem:[#allocation2 + $0x40] sm:$0xff]  ;;  %v86_v45 = vld [vmem:[#allocation2 + $0x38] sm:$0xff]  ;;  %v470_v0 = vmov 1983009808   ;;  %v103_v2 = vsub.s32 0, %v102_v63 }
  0x15   :  { %v41_v12 = vadd.f32 %v40_v10, %v39_v8  ;;  %v50_v13 = vadd.f32 %v49_v11, %v48_v9  ;;  %159 = vmatpush1.msra.mxu0 %v89_v38  ;;  %230 = vmatpush1.msra.mxu1 %v91_v41  ;;  %v80_v44 = vld [vmem:[#allocation2 + $0x8] sm:$0xff]  ;;  %v82_v46 = vld [vmem:[#allocation2 + $0x18] sm:$0xff]  ;;  %v79_v47 = vld [vmem:[#allocation2] sm:$0xff]  ;;  %v352_v1 = vunpack.c.l.s4 %v470_v0  ;;  %v111_v3 = vsub.s32 2, %v102_v63 }
  0x16   :  { %160 = vmatprep.subr.mxu0 %v85_v40  ;;  %231 = vmatprep.subr.mxu1 %v87_v43  ;;  %v81_v48 = vld [vmem:[#allocation2 + $0x10] sm:$0xff]  ;;  %v98_v57 = vld [vmem:[#allocation2 + $0x98] sm:$0xff]  ;;  %v88_v60 = vld [vmem:[#allocation2 + $0x48] sm:$0xff]  ;;  %v107_v4 = vsub.s32 1, %v102_v63  ;;  %v115_v5 = vsub.s32 3, %v102_v63 }
  0x17   :  { %v42_v14 = vrot.slane %v41_v12, 2  ;;  %v51_v15 = vrot.slane %v50_v13, 2  ;;  %161 = vmatpush1.msra.mxu0 %v84_v42  ;;  %232 = vmatpush1.msra.mxu1 %v86_v45  ;;  %v93_v59 = vld [vmem:[#allocation2 + $0x70] sm:$0xff]  ;;  %v83_v61 = vld [vmem:[#allocation2 + $0x20] sm:$0xff]  ;;  %v353_v7 = vunpack.c.0.s8 %v352_v1 }
  0x18   :  { %162 = vmatprep.subr.mxu0 %v80_v44  ;;  %233 = vmatprep.subr.mxu1 %v82_v46  ;;  %v99_v6 = vld [vmem:[%s528_s2] sm:$0x1f]  ;;  %s383_s2 = sshll.u32 %s471_s4, 4  ;;  %s384_s2 = int_to_ptr.vmem [resolvable:$true] %s383_s2 }
  0x19   :  { %v43_v16 = vadd.f32 %v42_v14, %v41_v12  ;;  %v52_v17 = vadd.f32 %v51_v15, %v50_v13  ;;  %163 = vmatpush1.msra.mxu0 %v79_v47  ;;  %196 = vmatprep.mubr.f32.mxu0 %v468_v49  ;;  %v104_v8 = vrot.slane %v99_v6, %v103_v2  ;;  %v119_v14 = vsub.s32 4, %v102_v63  ;;  %s441_s5 = scalar_lea.vmem %s384_s2, 160  ;;  %p446_p6 = scmp.lt.s32.totalorder %s384_s2, %s384_s2 }
  0x1a   :  { %234 = vmatpush1.msra.mxu1 %v81_v48  ;;  %267 = vmatprep.mubr.f32.mxu1 %v468_v49  ;;  %v112_v9 = vrot.slane %v99_v6, %v111_v3  ;;  %v108_v10 = vrot.slane %v99_v6, %v107_v4  ;;  %v116_v11 = vrot.slane %v99_v6, %v115_v5  ;;  %p442_p5 = scmp.ne.s32.totalorder %s384_s2, %s441_s5  ;;  %p447_p7 = scmp.lt.s32.totalorder %s441_s5, %s441_s5 }
  0x1b   :  { %v44_v18 = vrot.slane %v43_v16, 1  ;;  %v53_v19 = vrot.slane %v52_v17, 1  ;;  %401 = vmatprep.subr.mxu0 %v468_v49 }
  0x1c   :  { %p448_p8 = por %p447_p7, %p446_p6 }
  0x1d   :  { %v45_v22 = vadd.f32 %v44_v18, %v43_v16  ;;  %v54_v23 = vadd.f32 %v53_v19, %v52_v17  ;;  %v356_v16 = vsub.s32 %v353_v7, %v102_v63 }
  0x1e   :  { %p449_p9 = pnand %p448_p8, %p442_p5 }
  0x1f   :  { %v55_v24 = vsub.f32 %v45_v22, %v29_v20  ;;  %v56_v25 = vsub.f32 %v54_v23, %v30_v21 }
  0x21   :  { %v57_v26 = vmul.f32 0.125, %v55_v24  ;;  %v58_v27 = vmul.f32 0.125, %v56_v25  ;;  %v120_v24 = vrot.slane %v99_v6, %v119_v14 }
  0x23   :  { %v59_v28 = vmul.f32 %v57_v26, %v57_v26  ;;  %v60_v29 = vmul.f32 %v58_v27, %v58_v27 }
  0x25   :  { %v63_v30 = vrot.slane %v60_v29, 7 }
  0x27   :  { %v65_v31 = vsel %vm64_vm2, %v63_v30, %v59_v28 }
  0x28   :  { %v68_v32 = vsel %vm67_vm3, %v65_v31, 0.0 }
  0x29   :  { %69 = vadd.xlane.f32.xlu0 %v68_v32 }
  0xb2   :  { %v70_v50 = vpop.xlane.xlu0 %69 }
  0xb3   :  { %v71_v51 = vmax.f32 %v70_v50, 1e-24 }
  0xb5   :  { %419 = vrsqrt.f32 %v71_v51 }
  0xc2   :  { %v420_v52 = vpop.eup %419 }
  0xc3   :  { %v74_v53 = vrot.slane %v420_v52, 1  ;;  %v77_v55 = vmul.f32 %v420_v52, %v57_v26 }
  0xc5   :  { %v78_v54 = vmul.f32 %v74_v53, %v58_v27 }
  0xc7   :  { %v128_v56 = vrot.slane %v78_v54, 7 }
  0xc9   :  { %v129_v58 = vsel %vm64_vm2, %v128_v56, %v77_v55 }
  0xca   :  { %392 = vmatmul.mubr.msk.f32.vlgmr.msra.gmra.mxu0 %vm35_vm0, %v129_v58  ;;  %393 = vmatmul.mubr.msk.f32.vlgmr.msra.gmra.mxu1 %vm35_vm0, %v129_v58 }
  0xcb   :  { %402 = vmatpush3.msra.mxu0 %v98_v57  ;;  %409 = vmatprep.mubr.msk.f32.mxu0 %vm469_vm4, %v468_v49 }
  0xcc   :  { %403 = vmatprep.subr.mxu0 %v468_v49 }
  0xcd   :  { %404 = vmatpush3.msra.mxu0 %v93_v59 }
  0xce   :  { %405 = vmatprep.subr.mxu0 %v468_v49 }
  0xcf   :  { %406 = vmatpush3.msra.mxu0 %v88_v60 }
  0xd0   :  { %407 = vmatprep.subr.mxu0 %v468_v49 }
  0xd1   :  { %408 = vmatpush3.msra.mxu0 %v83_v61 }
  0xd2   :  { %410 = vmatmul.mubr.msk.f32.vlgmr.msra.gmra.mxu0 %vm35_vm0, %v129_v58 }
 0x18a   :  { %v198_v12 = vpop.f32.mrf.mxu0  ;;  %v269_v13 = vpop.f32.mrf.mxu1 }
 0x18b   :  { %v199_v18 = vadd.f32 %v198_v12, %v104_v8  ;;  %v270_v19 = vadd.f32 %v269_v13, %v112_v9 }
 0x18c   :  { %v200_v15 = vpop.f32.mrf.mxu0  ;;  %v271_v17 = vpop.f32.mrf.mxu1 }
 0x18d   :  { %v201_v20 = vadd.f32 %v200_v15, %v108_v10  ;;  %v272_v21 = vadd.f32 %v271_v17, %v116_v11 }
 0x18f   :  { %v349_v22 = vcombine.low %v199_v18, %v201_v20  ;;  %v350_v23 = vcombine.low %v270_v19, %v272_v21 }
 0x191   :  { %v357_v25 = vrot.slane %v349_v22, %v356_v16  ;;  %v364_v26 = vrot.slane %v350_v23, %v356_v16 }
 0x192   :  { %v340_v27 = vpop.f32.mrf.mxu0 }
 0x193   :  { %v341_v28 = vadd.f32 %v340_v27, %v120_v24  ;;  %v365_v29 = vcombine.low %v357_v25, %v364_v26 }
 0x194   :  { %v411_v30 = vpop.f32.mrf.mxu0 }
 0x195   :  { %395 = vst.sshfl [vmem:[#allocation5 + $0x8] sm:$0x3 pattern:$0x76325410] %v341_v28  ;;  %375 = vst [vmem:[#allocation5] sm:$0xff] %v365_v29 }
 0x196   :  { %452 = shalt.err (!%p449_p9)
}
 0x197   :  { %386 = dma.vmem_to_hbm [thread:$0]  %s384_s2, 160, %s529_s3, [#allocation4]  }
 0x198   :  { %463 = dma.done.wait [#allocation4], 160  }
 0x199   :  { %464 = vsyncadd [#allocation4], 4294967136 }
 0x19a   :  { %390 = vsyncpa [#allocation3], 1 }
 0x19b   :  { %391 = vsyncpa [#allocation4], 1 }

</bundles_post_ra>
